<compile_context>
chip_gen: v7x
topology: tpu7x:2x2x1
jax: 0.10.0
libtpu: 0.0.40
codegen_flags: <defaults>
</compile_context>

<pallas_src>
import math
from functools import partial

import numpy as np
import jax
import jax.numpy as jnp
from jax import lax
from jax.experimental import pallas as pl
from jax.experimental.pallas import tpu as pltpu


# ------------------------------ Pallas kernel ------------------------------ #

def _mha_kernel(q_ref, k_ref, v_ref, c_ref, b_ref, mask_ref, wo_ref, bo_ref,
                out_ref, heads_ref, *, num_heads, dim_k, exp_bf16):
    h = pl.program_id(1)

    # scores: [TQ, N] f32; contract the feature axes so the K "transpose" is
    # absorbed into the MXU operand fetch (no XLU transpose).
    a = lax.dot_general(q_ref[...], k_ref[...],
                        dimension_numbers=(((1,), (1,)), ((), ())),
                        preferred_element_type=jnp.float32)

    # spatial (b, head-invariant / VMEM-resident) + edge (c) encodings added
    # in-kernel; multiplicative 0/1 mask of the reference == select against 0.
    a = a + c_ref[...].astype(jnp.float32) + b_ref[...].astype(jnp.float32)
    a = jnp.where(mask_ref[...] != 0, a, 0.0)

    # softmax over the last dim (matches torch.softmax(a, dim=-1)).
    am = a - jnp.max(a, axis=-1, keepdims=True)
    if exp_bf16:
        # v6e/v7x: bf16 EUP -> halved [TQ, N] temporary; f32 denominator.
        p = jnp.exp(am.astype(jnp.bfloat16))
        denom = jnp.sum(p, axis=-1, keepdims=True, dtype=jnp.float32)
        s = p * pl.reciprocal(denom, approx=True).astype(jnp.bfloat16)
    else:
        p = jnp.exp(am)
        denom = jnp.sum(p, axis=-1, keepdims=True)
        s = (p * pl.reciprocal(denom, approx=True)).astype(jnp.bfloat16)

    head = jnp.dot(s, v_ref[...], preferred_element_type=jnp.float32)   # [TQ, dk]
    head_bf16 = head.astype(jnp.bfloat16)

    # Write this head's slice of the concat-head scratch.  Trace-time unroll
    # over heads keeps the lane slices STATIC (no dynamic minor-dim indexing).
    for hh in range(num_heads):
        @pl.when(h == hh)
        def _(hh=hh):
            heads_ref[:, hh * dim_k:(hh + 1) * dim_k] = head_bf16

    # Single fused output projection at the last head:
    # concat(head_h) @ Wo + bo  ==  [TQ, H*dk] @ [H*dk, dim_in] + bo.
    @pl.when(h == num_heads - 1)
    def _():
        out_ref[...] = (jnp.dot(heads_ref[...], wo_ref[...],
                                preferred_element_type=jnp.float32)
                        + bo_ref[...].astype(jnp.float32))


# ----------------------- per-generation tiling config ---------------------- #

def _chip_config():
    try:
        kind = jax.devices()[0].device_kind.lower()
    except Exception:
        kind = ""
    if "v7" in kind:        # 64 MiB physical VMEM, 2 TCs, bf16 EUP
        return dict(target_tq=256, vmem_budget=44 << 20, vmem_limit=52 << 20,
                    exp_bf16=True)
    if "v6" in kind:        # 128 MiB physical VMEM, bf16 EUP
        return dict(target_tq=512, vmem_budget=88 << 20, vmem_limit=96 << 20,
                    exp_bf16=True)
    if "v5" in kind or "v4" in kind:   # 128 MiB VMEM, no bf16 EUP/VPU
        return dict(target_tq=512, vmem_budget=88 << 20, vmem_limit=96 << 20,
                    exp_bf16=False)
    # unknown chip: conservative VMEM assumptions, f32 exp.
    return dict(target_tq=256, vmem_budget=40 << 20, vmem_limit=None,
                exp_bf16=False)


def _working_set_bytes(tq, n_cols, dim_k, num_heads, dim_in):
    c_bytes = 2 * tq * n_cols * 2            # bf16 c, double-buffered (dominant)
    b_bytes = tq * n_cols * 2                # head-invariant bf16 b
    mask_bytes = tq * n_cols * 1             # int8 mask
    kv_bytes = 2 * 2 * n_cols * dim_k * 2    # K and V, double-buffered bf16
    q_bytes = 2 * tq * dim_k * 2
    tmp_bytes = 3 * tq * n_cols * 4          # f32 score/softmax temporaries
    scratch = tq * num_heads * dim_k * 2 + tq * dim_in * 4
    wo_bytes = num_heads * dim_k * dim_in * 2
    return (c_bytes + b_bytes + mask_bytes + kv_bytes + q_bytes + tmp_bytes
            + scratch + wo_bytes)


def _pick_row_tile(N, dim_k, num_heads, dim_in, target, vmem_budget):
    """Row tile: multiple of 16, >=2 tiles when N>=32, VMEM-budgeted; padded N."""
    if N < 32:
        return N, N                          # tiny graphs: single full tile
    tq = min(target, max(16, ((N // 2) // 16) * 16))   # >= 2 row tiles (v7x 2 TCs)
    while tq > 16 and _working_set_bytes(tq, N, dim_k, num_heads, dim_in) > vmem_budget:
        new_tq = max(16, ((tq // 2) // 16) * 16)
        if new_tq == tq:
            break
        tq = new_tq
    n_pad = ((N + tq - 1) // tq) * tq
    return tq, n_pad


# --------------------------------- wrapper ---------------------------------- #

def graphormer_mha(x, b, c, mask, params):
    N, dim_in = x.shape
    H, _, dim_q = params["wq"].shape
    dim_k = params["wk"].shape[-1]
    cfg = _chip_config()

    # ---- hoisted, fused Q/K/V projection (single XLA batched GEMM); the
    #      1/sqrt(dim_q) scale is folded into Wq/bq (free weight preprocessing).
    scale = 1.0 / math.sqrt(dim_q)
    w_all = jnp.concatenate([params["wq"] * scale, params["wk"], params["wv"]], -1)
    b_all = jnp.concatenate([params["bq"] * scale, params["bk"], params["bv"]], -1)
    proj = jnp.einsum("nd,hde->hne", x, w_all,
                      preferred_element_type=jnp.float32) + b_all   # [H, N, dq+2dk]
    q = proj[:, :, :dim_q].astype(jnp.bfloat16)
    k = proj[:, :, dim_q:dim_q + dim_k].astype(jnp.bfloat16)
    v = proj[:, :, dim_q + dim_k:].astype(jnp.bfloat16)

    c_bf = c.astype(jnp.bfloat16)                  # [H, N, N]  (b NOT folded in)
    b_bf = b.astype(jnp.bfloat16)                  # [N, N]     head-invariant
    mask_i8 = (mask != 0).astype(jnp.int8)         # [N, N]     head-invariant
    wo = params["wo"].reshape(H * dim_k, dim_in).astype(jnp.bfloat16)
    bo = params["bo"].astype(jnp.float32)          # [1, dim_in]

    TQ, N_pad = _pick_row_tile(N, dim_k, H, dim_in,
                               cfg["target_tq"], cfg["vmem_budget"])
    pad = N_pad - N
    if pad:
        # Pad QUERY rows only (score columns / K / V keep the true N so the
        # softmax of real rows is untouched); padded output rows are sliced off.
        q = jnp.pad(q, ((0, 0), (0, pad), (0, 0)))
        c_bf = jnp.pad(c_bf, ((0, 0), (0, pad), (0, 0)))
        b_bf = jnp.pad(b_bf, ((0, pad), (0, 0)))
        mask_i8 = jnp.pad(mask_i8, ((0, pad), (0, 0)))

    kernel = partial(_mha_kernel, num_heads=H, dim_k=dim_k,
                     exp_bf16=cfg["exp_bf16"])

    out = pl.pallas_call(
        kernel,
        out_shape=jax.ShapeDtypeStruct((N_pad, dim_in), jnp.float32),
        grid_spec=pltpu.PrefetchScalarGridSpec(
            num_scalar_prefetch=0,
            grid=(N_pad // TQ, H),
            in_specs=[
                pl.BlockSpec((None, TQ, dim_q), lambda i, h: (h, i, 0)),   # Q tile
                pl.BlockSpec((None, N, dim_k), lambda i, h: (h, 0, 0)),    # K (full)
                pl.BlockSpec((None, N, dim_k), lambda i, h: (h, 0, 0)),    # V (full)
                pl.BlockSpec((None, TQ, N), lambda i, h: (h, i, 0)),       # c (per head)
                pl.BlockSpec((TQ, N), lambda i, h: (i, 0)),                # b (head-invariant)
                pl.BlockSpec((TQ, N), lambda i, h: (i, 0)),                # mask int8
                pl.BlockSpec((H * dim_k, dim_in), lambda i, h: (0, 0)),    # Wo (once/row tile)
                pl.BlockSpec((1, dim_in), lambda i, h: (0, 0)),            # bo
            ],
            out_specs=pl.BlockSpec((TQ, dim_in), lambda i, h: (i, 0)),
            scratch_shapes=[pltpu.VMEM((TQ, H * dim_k), jnp.bfloat16)],    # concat heads
        ),
        compiler_params=pltpu.CompilerParams(
            dimension_semantics=("parallel", "arbitrary"),
            vmem_limit_bytes=cfg["vmem_limit"]),
    )(q, k, v, c_bf, b_bf, mask_i8, wo, bo)
    return out[:N]


# ------------------------------- JAX glue ---------------------------------- #

def build_batch_mask(N, ptr):
    mask = np.zeros((N, N), np.float32)
    for i in range(len(ptr) - 1):
        mask[ptr[i]:ptr[i + 1], ptr[i]:ptr[i + 1]] = 1.0
    return jnp.asarray(mask)


def build_path_idx(N, edge_paths):
    # padded [N, N, Lmax] tensor of edge indices; -1 = padding / no path
    lens = [len(p) for d in edge_paths.values() for p in d.values()]
    L = max(lens) if lens else 1
    idx = -np.ones((N, N, L), np.int32)
    for src, dsts in edge_paths.items():
        for dst, path in dsts.items():
            for j, e in enumerate(path):
                idx[src, dst, j] = e
    return jnp.asarray(idx)


# TODO(synk): the dict-driven, variable-length edge-path gather (EdgeEncoding)
# is irregular / data-dependent, so it is lowered to a padded gather+mean in
# plain JAX glue rather than inside the Pallas kernel.
def edge_encoding_c(edge_scores, path_idx):
    # edge_scores: [E], path_idx: [N, N, L] -> c: [N, N]
    valid = path_idx >= 0
    g = jnp.where(valid, edge_scores[jnp.clip(path_idx, 0)], 0.0)
    cnt = valid.sum(-1).astype(jnp.float32)
    # mean over path edges; empty path -> nan_to_num -> 0 (absent cells stay 0)
    return jnp.where(cnt > 0, g.sum(-1) / jnp.maximum(cnt, 1.0), 0.0)


def init_params(key, H, dim_in, dim_q, dim_k, edge_dim):
    keys = jax.random.split(key, 9)

    def u(k, shape, fan_in):
        bound = 1.0 / math.sqrt(fan_in)
        return jax.random.uniform(k, shape, jnp.float32, -bound, bound)

    return {
        "wq": u(keys[0], (H, dim_in, dim_q), dim_in),
        "bq": u(keys[1], (H, 1, dim_q), dim_in),
        "wk": u(keys[2], (H, dim_in, dim_k), dim_in),
        "bk": u(keys[3], (H, 1, dim_k), dim_in),
        "wv": u(keys[4], (H, dim_in, dim_k), dim_in),
        "bv": u(keys[5], (H, 1, dim_k), dim_in),
        "w_edge": u(keys[6], (H, edge_dim), edge_dim),   # edge_lin (no bias)
        "wo": u(keys[7], (H, dim_k, dim_in), H * dim_k),
        "bo": u(keys[8], (1, dim_in), H * dim_k),
    }


def reference(x, b, c, mask, params):
    H = params["wq"].shape[0]
    dim_q = params["wq"].shape[-1]
    outs = []
    for h in range(H):
        q = x @ params["wq"][h] + params["bq"][h][0]
        k = x @ params["wk"][h] + params["bk"][h][0]
        v = x @ params["wv"][h] + params["bv"][h][0]
        a = (q @ k.T) / math.sqrt(dim_q)
        a = (a + b + c[h]) * mask
        s = jax.nn.softmax(a, axis=-1)
        outs.append(s @ v)
    cat = jnp.concatenate(outs, axis=-1)
    wo_full = params["wo"].reshape(-1, params["wo"].shape[-1])
    return cat @ wo_full + params["bo"][0]


# ---------------------------------- main ------------------------------------ #

if __name__ == "__main__":
    H, dim_in, dim_q, dim_k, edge_dim = 2, 16, 16, 16, 8
    N = 8                       # nodes across the whole batch of graphs
    E = 6                       # edges
    ptr = [0, 4, 8]             # two graphs of 4 nodes each

    # pairwise node paths given as lists of edge indices (like edge_paths dict)
    edge_paths = {
        0: {1: [0], 2: [0, 1], 3: [0, 1, 2]},
        1: {2: [1], 3: [1, 2]},
        2: {3: [2]},
        4: {5: [3], 6: [3, 4]},
        5: {6: [4], 7: [4, 5]},
        6: {7: [5]},
    }

    key = jax.random.PRNGKey(0)
    kx, ke, kb, kp = jax.random.split(key, 4)
    x = jax.random.normal(kx, (N, dim_in), jnp.float32)
    edge_attr = jax.random.normal(ke, (E, edge_dim), jnp.float32)
    b = jax.random.normal(kb, (N, N), jnp.float32)          # spatial encoding
    params = init_params(kp, H, dim_in, dim_q, dim_k, edge_dim)

    mask = build_batch_mask(N, ptr)
    path_idx = build_path_idx(N, edge_paths)

    # per-head edge scores (edge_lin) then padded-path mean -> c [H, N, N]
    edge_scores = edge_attr @ params["w_edge"].T             # [E, H]
    c = jax.vmap(edge_encoding_c, in_axes=(1, None), out_axes=0)(edge_scores, path_idx)

    out = graphormer_mha(x, b, c, mask, params)
    out = jax.block_until_ready(out)

    ref = reference(x, b, c, mask, params)
    assert out.shape == (N, dim_in)
    # bf16 MXU operands (f32 accumulation), bf16 exp on v6e/v7x and the approx
    # reciprocal -> looser tolerance than the pure-f32 reference.
    assert jnp.allclose(out, ref, atol=5e-2, rtol=5e-2), "mismatch vs. reference"

    print("KERNEL_OK")
</pallas_src>

<mosaic_0001>
module attributes {stable_mosaic.version = 11 : i64} {
  func.func @_mha_kernel(%arg0: i32, %arg1: i32, %arg2: memref<1x8x16xbf16, #tpu.memory_space<vmem>>, %arg3: memref<1x8x16xbf16, #tpu.memory_space<vmem>>, %arg4: memref<1x8x16xbf16, #tpu.memory_space<vmem>>, %arg5: memref<1x8x8xbf16, #tpu.memory_space<vmem>>, %arg6: memref<8x8xbf16, #tpu.memory_space<vmem>>, %arg7: memref<8x8xi8, #tpu.memory_space<vmem>>, %arg8: memref<32x16xbf16, #tpu.memory_space<vmem>>, %arg9: memref<1x16xf32, #tpu.memory_space<vmem>>, %arg10: memref<8x16xf32, #tpu.memory_space<vmem>>, %arg11: memref<8x32xbf16, #tpu.memory_space<vmem>>) attributes {dimension_semantics = [#tpu.dimension_semantics<parallel>, #tpu.dimension_semantics<arbitrary>], iteration_bounds = array<i64: 1, 2>, scalar_prefetch = 0 : i64, scratch_operands = 1 : i64, tpu.core_type = #tpu.core_type<tc>, window_params = [{transform_indices = @transform_0, window_bounds = array<i64: 1, 8, 16>}, {transform_indices = @transform_1, window_bounds = array<i64: 1, 8, 16>}, {transform_indices = @transform_2, window_bounds = array<i64: 1, 8, 16>}, {transform_indices = @transform_3, window_bounds = array<i64: 1, 8, 8>}, {transform_indices = @transform_4, window_bounds = array<i64: 8, 8>}, {transform_indices = @transform_5, window_bounds = array<i64: 8, 8>}, {pipeline_mode = #tpu.pipeline_mode<synchronous>, transform_indices = @transform_6, window_bounds = array<i64: 32, 16>}, {pipeline_mode = #tpu.pipeline_mode<synchronous>, transform_indices = @transform_7, window_bounds = array<i64: 1, 16>}, {transform_indices = @transform_8, window_bounds = array<i64: 8, 16>}]} {
    %c0 = arith.constant 0 : index
    %c0_0 = arith.constant 0 : index
    %c0_1 = arith.constant 0 : index
    %0 = vector.load %arg2[%c0, %c0_0, %c0_1] : memref<1x8x16xbf16, #tpu.memory_space<vmem>>, vector<1x8x16xbf16>
    %1 = vector.shape_cast %0 : vector<1x8x16xbf16> to vector<8x16xbf16>
    %c0_2 = arith.constant 0 : index
    %c0_3 = arith.constant 0 : index
    %c0_4 = arith.constant 0 : index
    %2 = vector.load %arg3[%c0_2, %c0_3, %c0_4] : memref<1x8x16xbf16, #tpu.memory_space<vmem>>, vector<1x8x16xbf16>
    %3 = vector.shape_cast %2 : vector<1x8x16xbf16> to vector<8x16xbf16>
    %cst = arith.constant dense<0.000000e+00> : vector<8x8xf32>
    %4 = tpu.matmul %1, %3, %cst {dimension_numbers = #tpu.dot_dimension_numbers<[1], [1], [0], [0], [0, 0, 1, 0], [], []>} : vector<8x16xbf16>, vector<8x16xbf16>, vector<8x8xf32> -> vector<8x8xf32>
    %c0_5 = arith.constant 0 : index
    %c0_6 = arith.constant 0 : index
    %c0_7 = arith.constant 0 : index
    %5 = vector.load %arg5[%c0_5, %c0_6, %c0_7] : memref<1x8x8xbf16, #tpu.memory_space<vmem>>, vector<1x8x8xbf16>
    %6 = vector.shape_cast %5 : vector<1x8x8xbf16> to vector<8x8xbf16>
    %7 = arith.extf %6 : vector<8x8xbf16> to vector<8x8xf32>
    %8 = arith.addf %4, %7 : vector<8x8xf32>
    %c0_8 = arith.constant 0 : index
    %c0_9 = arith.constant 0 : index
    %9 = vector.load %arg6[%c0_8, %c0_9] : memref<8x8xbf16, #tpu.memory_space<vmem>>, vector<8x8xbf16>
    %10 = arith.extf %9 : vector<8x8xbf16> to vector<8x8xf32>
    %11 = arith.addf %8, %10 : vector<8x8xf32>
    %c0_10 = arith.constant 0 : index
    %c0_11 = arith.constant 0 : index
    %12 = vector.load %arg7[%c0_10, %c0_11] : memref<8x8xi8, #tpu.memory_space<vmem>>, vector<8x8xi8>
    %c0_i8 = arith.constant 0 : i8
    %13 = vector.broadcast %c0_i8 : i8 to vector<8x8xi8>
    %14 = arith.cmpi ne, %12, %13 : vector<8x8xi8>
    %cst_12 = arith.constant 0.000000e+00 : f32
    %15 = vector.broadcast %cst_12 : f32 to vector<8x8xf32>
    %16 = arith.select %14, %11, %15 : vector<8x8xi1>, vector<8x8xf32>
    %cst_13 = arith.constant dense<0xFF800000> : vector<8xf32>
    %17 = vector.multi_reduction <maximumf>, %16, %cst_13 [1] : vector<8x8xf32> to vector<8xf32>
    %18 = vector.shape_cast %17 : vector<8xf32> to vector<8x1xf32>
    %19 = vector.broadcast %18 : vector<8x1xf32> to vector<8x8xf32>
    %20 = arith.subf %16, %19 : vector<8x8xf32>
    %21 = math.exp %20 : vector<8x8xf32>
    %cst_14 = arith.constant dense<0.000000e+00> : vector<8xf32>
    %22 = vector.multi_reduction <add>, %21, %cst_14 [1] : vector<8x8xf32> to vector<8xf32>
    %23 = vector.shape_cast %22 : vector<8xf32> to vector<8x1xf32>
    %24 = tpu.reciprocal %23 {approx = true} : vector<8x1xf32> -> vector<8x1xf32>
    %25 = vector.broadcast %24 : vector<8x1xf32> to vector<8x8xf32>
    %26 = arith.mulf %21, %25 : vector<8x8xf32>
    %27 = arith.truncf %26 : vector<8x8xf32> to vector<8x8xbf16>
    %c0_15 = arith.constant 0 : index
    %c0_16 = arith.constant 0 : index
    %c0_17 = arith.constant 0 : index
    %28 = vector.load %arg4[%c0_15, %c0_16, %c0_17] : memref<1x8x16xbf16, #tpu.memory_space<vmem>>, vector<1x8x16xbf16>
    %29 = vector.shape_cast %28 : vector<1x8x16xbf16> to vector<8x16xbf16>
    %cst_18 = arith.constant dense<0.000000e+00> : vector<8x16xf32>
    %30 = tpu.matmul %27, %29, %cst_18 {dimension_numbers = #tpu.dot_dimension_numbers<[1], [0], [0], [1], [0, 0, 1, 1], [], []>} : vector<8x8xbf16>, vector<8x16xbf16>, vector<8x16xf32> -> vector<8x16xf32>
    %31 = arith.truncf %30 : vector<8x16xf32> to vector<8x16xbf16>
    %c0_i32 = arith.constant 0 : i32
    %32 = arith.cmpi eq, %arg1, %c0_i32 : i32
    %33 = arith.extui %32 : i1 to i32
    %c0_i32_19 = arith.constant 0 : i32
    %34 = arith.cmpi ne, %33, %c0_i32_19 : i32
    scf.if %34 {
      %c0_23 = arith.constant 0 : index
      %c0_24 = arith.constant 0 : index
      %41 = vector.load %arg11[%c0_23, %c0_24] : memref<8x32xbf16, #tpu.memory_space<vmem>>, vector<8x16xbf16>
      tpu.vector_store %arg11[%c0_23, %c0_24], %31 {strides = array<i32>} : memref<8x32xbf16, #tpu.memory_space<vmem>>, vector<8x16xbf16>,
    } else {
    }
    %c1_i32 = arith.constant 1 : i32
    %35 = arith.cmpi eq, %arg1, %c1_i32 : i32
    %36 = arith.extui %35 : i1 to i32
    %c0_i32_20 = arith.constant 0 : i32
    %37 = arith.cmpi ne, %36, %c0_i32_20 : i32
    scf.if %37 {
      %c0_23 = arith.constant 0 : index
      %c16 = arith.constant 16 : index
      %41 = vector.load %arg11[%c0_23, %c16] : memref<8x32xbf16, #tpu.memory_space<vmem>>, vector<8x16xbf16>
      tpu.vector_store %arg11[%c0_23, %c16], %31 {strides = array<i32>} : memref<8x32xbf16, #tpu.memory_space<vmem>>, vector<8x16xbf16>,
    } else {
    }
    %c1_i32_21 = arith.constant 1 : i32
    %38 = arith.cmpi eq, %arg1, %c1_i32_21 : i32
    %39 = arith.extui %38 : i1 to i32
    %c0_i32_22 = arith.constant 0 : i32
    %40 = arith.cmpi ne, %39, %c0_i32_22 : i32
    scf.if %40 {
      %c0_23 = arith.constant 0 : index
      %c0_24 = arith.constant 0 : index
      %41 = vector.load %arg11[%c0_23, %c0_24] : memref<8x32xbf16, #tpu.memory_space<vmem>>, vector<8x32xbf16>
      %c0_25 = arith.constant 0 : index
      %c0_26 = arith.constant 0 : index
      %42 = vector.load %arg8[%c0_25, %c0_26] : memref<32x16xbf16, #tpu.memory_space<vmem>>, vector<32x16xbf16>
      %cst_27 = arith.constant dense<0.000000e+00> : vector<8x16xf32>
      %43 = tpu.matmul %41, %42, %cst_27 {dimension_numbers = #tpu.dot_dimension_numbers<[1], [0], [0], [1], [0, 0, 1, 1], [], []>} : vector<8x32xbf16>, vector<32x16xbf16>, vector<8x16xf32> -> vector<8x16xf32>
      %c0_28 = arith.constant 0 : index
      %c0_29 = arith.constant 0 : index
      %44 = vector.load %arg9[%c0_28, %c0_29] : memref<1x16xf32, #tpu.memory_space<vmem>>, vector<1x16xf32>
      %45 = vector.broadcast %44 : vector<1x16xf32> to vector<8x16xf32>
      %46 = arith.addf %43, %45 : vector<8x16xf32>
      %c0_30 = arith.constant 0 : index
      %c0_31 = arith.constant 0 : index
      %47 = vector.load %arg10[%c0_30, %c0_31] : memref<8x16xf32, #tpu.memory_space<vmem>>, vector<8x16xf32>
      tpu.vector_store %arg10[%c0_30, %c0_31], %46 {strides = array<i32>} : memref<8x16xf32, #tpu.memory_space<vmem>>, vector<8x16xf32>,
    } else {
    }
    return
  }
  func.func @transform_0(%arg0: i32, %arg1: i32) -> (i32, i32, i32) {
    %c0_i32 = arith.constant 0 : i32
    %c0_i32_0 = arith.constant 0 : i32
    return %arg1, %arg0, %c0_i32 : i32, i32, i32
  }
  func.func @transform_1(%arg0: i32, %arg1: i32) -> (i32, i32, i32) {
    %c0_i32 = arith.constant 0 : i32
    %c0_i32_0 = arith.constant 0 : i32
    %c0_i32_1 = arith.constant 0 : i32
    return %arg1, %c0_i32, %c0_i32_0 : i32, i32, i32
  }
  func.func @transform_2(%arg0: i32, %arg1: i32) -> (i32, i32, i32) {
    %c0_i32 = arith.constant 0 : i32
    %c0_i32_0 = arith.constant 0 : i32
    %c0_i32_1 = arith.constant 0 : i32
    return %arg1, %c0_i32, %c0_i32_0 : i32, i32, i32
  }
  func.func @transform_3(%arg0: i32, %arg1: i32) -> (i32, i32, i32) {
    %c0_i32 = arith.constant 0 : i32
    %c0_i32_0 = arith.constant 0 : i32
    return %arg1, %arg0, %c0_i32 : i32, i32, i32
  }
  func.func @transform_4(%arg0: i32, %arg1: i32) -> (i32, i32) {
    %c0_i32 = arith.constant 0 : i32
    %c0_i32_0 = arith.constant 0 : i32
    return %arg0, %c0_i32 : i32, i32
  }
  func.func @transform_5(%arg0: i32, %arg1: i32) -> (i32, i32) {
    %c0_i32 = arith.constant 0 : i32
    %c0_i32_0 = arith.constant 0 : i32
    return %arg0, %c0_i32 : i32, i32
  }
  func.func @transform_6(%arg0: i32, %arg1: i32) -> (i32, i32) {
    %c0_i32 = arith.constant 0 : i32
    %c0_i32_0 = arith.constant 0 : i32
    %c0_i32_1 = arith.constant 0 : i32
    return %c0_i32, %c0_i32_0 : i32, i32
  }
  func.func @transform_7(%arg0: i32, %arg1: i32) -> (i32, i32) {
    %c0_i32 = arith.constant 0 : i32
    %c0_i32_0 = arith.constant 0 : i32
    %c0_i32_1 = arith.constant 0 : i32
    return %c0_i32, %c0_i32_0 : i32, i32
  }
  func.func @transform_8(%arg0: i32, %arg1: i32) -> (i32, i32) {
    %c0_i32 = arith.constant 0 : i32
    %c0_i32_0 = arith.constant 0 : i32
    return %arg0, %c0_i32 : i32, i32
  }
}

</mosaic_0001>

<bundles_post_ra>
// kernel: tpu_custom_call.1
= control target key start
LH: loop header
LB: loop body
LE: loop exit
PB: predicated region body
PF: predicated region fallthrough
CT: control target
= control target key end

     0   :  { %13 = vsyncpa [#allocation4], 0  ;;  %s1258_s0 = inlined_call_operand.vmem [shape: bf16[2,8,16], index: 0, kind: input, shape index: {}]   ;;  %s1259_s1 = inlined_call_operand.vmem [shape: bf16[2,8,16], index: 1, kind: input, shape index: {}]   ;;  %s1260_s2 = inlined_call_operand.vmem [shape: bf16[2,8,16], index: 2, kind: input, shape index: {}]   ;;  %s1261_s3 = inlined_call_operand.hbm [shape: bf16[2,8,8], index: 3, kind: input, shape index: {}]   ;;  %s1262_s4 = inlined_call_operand.vmem [shape: bf16[8,8], index: 4, kind: input, shape index: {}]   ;;  %s1263_s5 = inlined_call_operand.vmem [shape: s8[8,8], index: 5, kind: input, shape index: {}]   ;;  %s1264_s6 = inlined_call_operand.vmem [shape: bf16[32,16], index: 6, kind: input, shape index: {}]   ;;  %s1265_s7 = inlined_call_operand.vmem [shape: f32[1,16], index: 7, kind: input, shape index: {}]   ;;  %s1266_s8 = inlined_call_operand.hbm [shape: f32[8,16], index: 8, kind: output, shape index: {}]  }
   0x1   :  { %15 = vsyncpa [#allocation4 + $0x1], 0 }
   0x2   :  { %16 = vsyncpa [#allocation5], 0  ;;  %s1069_s27 = smov 0   ;;  %s1071_s28 = smov 0  }
   0x3   :  { %s1073_s29 = smov 0   ;;  %s1075_s30 = smov 0  }
   0x4   :  { %s1077_s9 = smov 0   ;;  %s1079_s10 = smov 0  }
   0x5 LB: > { %s777_s11 = sadd.s32 4294967295, %s1014_s10   ;;  %s31_s12 = sadd.s32 1, %s1010_s9  ;;  %s1014_s10 = sphi %s1079_s10, %s22_s10   ;;  %s1010_s9 = sphi %s1077_s9, %s1277_s9   ;;  %s1006_s30 = sphi %s1075_s30, %s1276_s30   ;;  %s1002_s29 = sphi %s1073_s29, %s1275_s29   ;;  %s998_s28 = sphi %s1071_s28, %s1274_s28   ;;  %s994_s27 = sphi %s1069_s27, %s1273_s27  }
   0x6   : > { %p32_p0 = scmp.ge.s32.totalorder %s31_s12, 2  ;;  %s123_s13 = sadd.s32 1, %s1002_s29 }
   0x7   : > { %p130_p1 = scmp.ne.s32.totalorder %s1002_s29, %s998_s28  ;;  %p131_p2 = scmp.eq.s32.totalorder %s1014_s10, 0 }
   0x8   : > { %s1279_s12 = smov (%p32_p0, %s31_s12), 0  ;;  %p136_p4 = scmp.ne.s32.totalorder %s998_s28, %s994_s27 }
   0x9   : > { %p1105_p3 = por %p131_p2, %p130_p1  ;;  %s118_s15 = ssub.s32 %s1010_s9, %s1279_s12 }
   0xa   : > { %p137_p5 = scmp.eq.s32.totalorder %s777_s11, 0  ;;  %p121_p6 = scmp.eq.s32.totalorder %s118_s15, 0 }
   0xb   : > { %p840_p8 = scmp.lt.s32.totalorder %s1014_s10, 2  ;;  %s324_s18 = sand.u32 1, %s1002_s29  }
   0xc   : > { %p1114_p7 = por %p137_p5, %p136_p4  ;;  %s783_s19 = sshll.u32 %s1010_s9, 6 }
   0xd   : > { %s1120_s17 = scalar_select %p121_p6, %s1002_s29, %s123_s13  }
   0xe   : > { %s782_s20 = sshll.u32 %s324_s18, 2  ;;  %s1127_s23 = scalar_lea.hbm %s1261_s3, %s783_s19 }
   0xf   : > { %s328_s24 = scalar_lea.vmem [#allocation3], %s782_s20  ;;  %p1131_p9 = pnand %p840_p8, %p1105_p3 }
  0x10   : > { %s336_s25 = sshll.u32 %s328_s24, 4  ;;  %s325_s27 = scalar_lea.sflag [#allocation4], %s324_s18  ;;  %s1135_s25 = int_to_ptr.vmem [resolvable:$true] %s336_s25 }
  0x11   : > { %s904_s13 = scalar_lea.hbm %s1127_s23, 64  ;;  %p906_p13 = pneg %p1131_p9 }
  0x12   : > { %p905_p12 = scmp.ne.s32.totalorder %s1127_s23, %s904_s13  ;;  %s909_s19 = scalar_lea.hbm %s1261_s3, 128 }
  0x13   : > { %p910_p2 = scmp.lt.u32.totalorder %s1127_s23, %s1261_s3  ;;  %p911_p3 = scmp.lt.u32.totalorder %s909_s19, %s904_s13 }
  0x14   : > { %p907_p0 = pnand %p906_p13, %p905_p12  ;;  %p913_p5 = scmp.lt.u32.totalorder %s904_s13, %s1127_s23 }
  0x15   : > { %p912_p4 = por %p911_p3, %p910_p2 }
  0x16   : > { %p908_p1 = pneg %p907_p0 }
  0x17   : > { %p914_p6 = por %p913_p5, %p912_p4 }
  0x19   : > { %p915_p8 = pnand %p914_p6, %p908_p1 }
  0x1b   : > { %918 = shalt.err (!%p915_p8)
}
  0x1c   : > { %s919_s18 = scalar_lea.vmem %s1135_s25, 64  ;;  %s1016_s22 = smov [#allocation3]  }
  0x1d   : > { %p920_p12 = scmp.ne.s32.totalorder %s1135_s25, %s919_s18  ;;  %s924_s24 = sshll.u32 %s1016_s22, 4  ;;  %s925_s24 = int_to_ptr.vmem [resolvable:$false] %s924_s24 }
  0x1e   : > { %s926_s14 = scalar_lea.vmem %s925_s24, 128  ;;  %p927_p11 = scmp.lt.s32.totalorder %s1135_s25, %s925_s24 }
  0x1f   : > { %p922_p0 = pnand %p920_p12, %p906_p13  ;;  %p928_p2 = scmp.lt.s32.totalorder %s926_s14, %s919_s18 }
  0x21   : > { %p923_p10 = pneg %p922_p0  ;;  %p929_p3 = por %p928_p2, %p927_p11 }
  0x23   : > { %p930_p4 = pnand %p929_p3, %p923_p10 }
  0x25   : > { %933 = shalt.err (!%p930_p4)
}
  0x26   : > { %839 = dma.hbm_to_vmem [thread:$0]  (!%p1131_p9), %s1127_s23, 64, %s1135_s25, %s325_s27  }
  0x27   : > { %p1270_p1 = scmp.lt.s32.totalorder %s1014_s10, 3  ;;  %p1271_p5 = scmp.ge.s32.totalorder %s1014_s10, 1 }
  0x29   : > { %p342_p13 = pnand %p1271_p5, %p1270_p1 }
  0x2a   : > { %s347_s13 = sand.u32 (!%p342_p13), 1, %s998_s28  }
  0x2b   : > { %345 = sbr.rel (%p342_p13) target bundleno = 1179 (0x49b), region = 52  ;;  %s785_s15 = sshll.u32 (!%p342_p13), %s347_s13, 2 }
  0x2c   : > { %s348_s19 = scalar_lea.sflag (!%p342_p13), [#allocation4], %s347_s13  ;;  %s351_s20 = scalar_lea.vmem (!%p342_p13), [#allocation3], %s785_s15 }
  0x32   : > { %985 = dma.done.wait (%p1114_p7), %s348_s19, 64  }
  0x33   : > { %987 = vsyncadd (%p1114_p7), %s348_s19, 4294967232  ;;  %p402_p10 = scmp.lt.s32.totalorder %s1006_s30, 1  ;;  %v1017_v0 = vmov 0.0   ;;  %vm1018_vm0 = vmmov 0   ;;  %vm432_vm1 = vcmask 130048   ;;  %v1019_v6 = vmov 0  }
  0x34   : > { %810 = vmatprep.subr.bf16.mxu0 %v1017_v0  ;;  %812 = vmatprep.mubr.msk.bf16.mxu0 %vm1018_vm0, %v1017_v0  ;;  %v482_v4 = vld [vmem:[%s1263_s5] sm:$0x3]  ;;  %v430_v5 = vld [vmem:[%s351_s20] sm:$0xf]  ;;  %vm488_vm4 = vcmask 64512   ;;  %vm505_vm5 = vcmask 1043456  }
  0x35   : > { %s403_s23 = scalar_select %p402_p10, %s1006_s30, 1  ;;  %816 = vmatprep.subr.bf16.mxu1 %v1017_v0  ;;  %818 = vmatprep.mubr.msk.bf16.mxu1 %vm1018_vm0, %v1017_v0  ;;  %vm483_vm2 = vnez %v482_v4  ;;  %v479_v8 = vld [vmem:[%s1262_s4] sm:$0xf]  ;;  %v431_v9 = vunpack.c.l.bf16 %v430_v5 }
  0x36   : > { %v484_v7 = vsel %vm483_vm2, 16843009, %v1019_v6  ;;  %v480_v11 = vunpack.c.l.bf16 %v479_v8  ;;  %p791_p7 = scmp.ne.s32.totalorder %s1006_s30, 0 }
  0x37   : > { %s1175_s25 = sshll.u32 %s403_s23, 2  ;;  %v485_v10 = vunpack.c.0.s8 %v484_v7  ;;  %vm554_vm6 = vcmask (!%p791_p7), 125952  }
  0x38   : > { %s412_s21 = scalar_lea.vmem %s1259_s1, %s1175_s25  ;;  %s408_s22 = scalar_lea.vmem %s1258_s0, %s1175_s25 }
  0x39   : > { %v429_v1 = vld [vmem:[%s412_s21] sm:$0xf]  ;;  %vm486_vm3 = vcmp.ne.s32.totalorder %v485_v10, 0  ;;  %s416_s23 = scalar_lea.vmem %s1260_s2, %s1175_s25 }
  0x3a   : > { %v437_v2 = vsel %vm432_vm1, %v429_v1, 0  ;;  %v428_v3 = vld [vmem:[%s408_s22] sm:$0xf] }
  0x3b   : > { %811 = vmatpush3.bf16.xpose.msra.mxu0 %v437_v2  ;;  %v501_v25 = vld [vmem:[%s416_s23] sm:$0xf] }
  0x3c   : > { %v507_v26 = vsel %vm505_vm5, %v501_v25, 0 }
  0x3d   : > { %817 = vmatpush3.bf16.msra.mxu1 %v507_v26 }
  0x42   : > { %813 = vmatmul.mubr.msk.bf16.vlgmr.msra.gmra.mrb[0].mxu0 %vm432_vm1, %v428_v3 }
 0x115   : > { %v473_v12 = vpop.f32.mrb[0].mxu0 }
 0x116   : > { %v474_v13 = vadd.f32 %v473_v12, %v431_v9  ;;  %v814_v14 = vpop.f32.mrb[1].mxu0 }
 0x117   : > { %v476_v15 = vpop.f32.mrb[2].mxu0 }
 0x118   : > { %v481_v16 = vadd.f32 %v480_v11, %v474_v13  ;;  %v815_v17 = vpop.f32.mrb[3].mxu0 }
 0x11a   : > { %v487_v18 = vsel %vm486_vm3, %v481_v16, 0.0 }
 0x11b   : > { %v489_v19 = vsel %vm488_vm4, %v487_v18, -inf }
 0x11c   : > { %490 = vmax.xlane.f32.xlu0 %v489_v19 }
 0x1a9   : > { %v491_v20 = vpop.xlane.xlu0 %490 }
 0x1aa   : > { %v492_v21 = vsub.f32 %v487_v18, %v491_v20 }
 0x1ac   : > { %v493_v22 = vmul.f32 1.442695, %v492_v21 }
 0x1ae   : > { %898 = vpow2.f32 %v493_v22 }
 0x1b8   : > { %v899_v23 = vpop.eup %898 }
 0x1b9   : > { %v495_v24 = vsel %vm488_vm4, %v899_v23, 0.0 }
 0x1ba   : > { %496 = vadd.xlane.f32.xlu0 %v495_v24 }
 0x247   : > { %v497_v27 = vpop.xlane.xlu0 %496 }
 0x248   : > { %900 = vrcp.f32 %v497_v27 }
 0x252   : > { %v901_v28 = vpop.eup %900 }
 0x253   : > { %v499_v29 = vmul.f32 %v901_v28, %v899_v23 }
 0x255   : > { %v500_v30 = vpack.c.bf16 %v499_v29, %v499_v29 }
 0x257   : > { %819 = vmatmul.mubr.msk.bf16.vlgmr.msra.gmra.mrb[0].mxu1 %vm488_vm4, %v500_v30 }
 0x327   : > { %553 = sbr.rel (%p791_p7) target bundleno = 814 (0x32e), region = 60 }
 0x32a   : > { %v543_v31 = vpop.f32.mrb[0].mxu1 }
 0x32b   : > { %v549_v32 = vpack.c.bf16 %v543_v31, %v543_v31  ;;  %v820_v33 = vpop.f32.mrb[1].mxu1 }
 0x32c   : > { %v546_v34 = vpop.f32.mrb[2].mxu1 }
 0x32d   : > { %v821_v35 = vpop.f32.mrb[3].mxu1  ;;  %555 = vst.msk [vmem:[#allocation2] sm:$0xf] (!%p791_p7), %vm554_vm6, %v549_v32 }
 0x32e PF: > { %p792_p9 = scmp.ne.s32.totalorder %s1006_s30, 1 }
 0x32f   : > { %v902_v36 = vld [vmem:[%s1264_s6] sm:$0xff] (!%p792_p9)   ;;  %s1020_s27 = smov (!%p792_p9), 16   ;;  %v1021_v37 = vmov (!%p792_p9), 0.0   ;;  %v903_v38 = vld [vmem:[%s1264_s6 + $0x8] sm:$0xff] (!%p792_p9)   ;;  %vm1022_vm7 = vmmov (!%p792_p9), 0   ;;  %vm566_vm8 = vcmask (!%p792_p9), 257152  }
 0x330   : > { %559 = sbr.rel (%p792_p9) target bundleno = 1154 (0x482), region = 64  ;;  %563 = vrot.lane.b32.xlu0 (!%p792_p9), %v549_v32, %s1020_s27  ;;  %822 = vmatprep.subr.bf16.mxu0 (!%p792_p9), %v1021_v37  ;;  %vm592_vm9 = vcmask (!%p792_p9), 261120   ;;  %v794_v41 = vld [vmem:[%s1265_s7] ss:$0 sm:$0xff] (!%p792_p9) }
 0x331   : > { %823 = vmatpush3.bf16.msra.mxu0 (!%p792_p9), %v902_v36  ;;  %826 = vmatprep.mubr.msk.bf16.mxu0 (!%p792_p9), %vm1022_vm7, %v1021_v37 }
 0x332   : > { %824 = vmatprep.subr.bf16.mxu0 (!%p792_p9), %v1021_v37 }
 0x335   : > { %825 = vmatpush3.bf16.msra.mxu0 (!%p792_p9), %v903_v38 }
 0x3a2   : > { %v564_v39 = vpop.permute.xlu0 %563 }
 0x3a3   : > { %567 = vst.msk [vmem:[#allocation2] sm:$0xf] %vm566_vm8, %v564_v39 }
 0x3aa   : > { %v568_v40 = vld [vmem:[#allocation2] sm:$0xf] }
 0x3ab   : > { %827 = vmatmul.mubr.msk.bf16.vlgmr.msra.gmra.mrb[0].mxu0 %vm592_vm9, %v568_v40 }
 0x47e   : > { %v630_v42 = vpop.f32.mrb[0].mxu0 }
 0x47f   : > { %v631_v43 = vadd.f32 %v794_v41, %v630_v42  ;;  %v828_v44 = vpop.f32.mrb[1].mxu0 }
 0x480   : > { %v633_v45 = vpop.f32.mrb[2].mxu0 }
 0x481   : > { %636 = vst.msk [vmem:[#allocation6] sm:$0xff] %vm432_vm1, %v631_v43  ;;  %v829_v46 = vpop.f32.mrb[3].mxu0 }
 0x482 PF: > { %p1214_p11 = scmp.eq.s32.totalorder %s777_s11, 1  ;;  %s1023_s24 = smov [#allocation6]  }
 0x483   : > { %s646_s14 = sshll.u32 %s1023_s24, 4  ;;  %s647_s14 = int_to_ptr.vmem [resolvable:$true] %s646_s14 }
 0x484   : > { %s934_s13 = scalar_lea.vmem %s647_s14, 128  ;;  %p941_p0 = scmp.lt.s32.totalorder %s647_s14, %s647_s14 }
 0x485   : > { %p935_p6 = scmp.ne.s32.totalorder %s647_s14, %s934_s13  ;;  %p942_p2 = scmp.lt.s32.totalorder %s934_s13, %s934_s13 }
 0x487   : > { %p936_p8 = pnand %p935_p6, %p1214_p11  ;;  %p943_p3 = por %p942_p2, %p941_p0 }
 0x489   : > { %p937_p12 = pneg %p936_p8 }
 0x48b   : > { %p944_p4 = pnand %p943_p3, %p937_p12 }
 0x48d   : > { %947 = shalt.err (!%p944_p4)
}
 0x48e   : > { %s948_s11 = scalar_lea.hbm %s1266_s8, 128 }
 0x48f   : > { %p949_p1 = scmp.ne.s32.totalorder %s1266_s8, %s948_s11  ;;  %p954_p10 = scmp.lt.u32.totalorder %s948_s11, %s1266_s8 }
 0x491   : > { %p950_p5 = pnand %p949_p1, %p1214_p11 }
 0x493   : > { %p951_p13 = pneg %p950_p5 }
 0x495   : > { %p956_p7 = pnand %p954_p10, %p951_p13 }
 0x497   : > { %959 = shalt.err (!%p956_p7)
}
 0x498   : > { %833 = dma.vmem_to_hbm [thread:$0]  (%p1214_p11), %s647_s14, 128, %s1266_s8, [#allocation5]  }
 0x499   : > { %989 = dma.done.wait (%p1214_p11), [#allocation5], 128  }
 0x49a   : > { %991 = vsyncadd (%p1214_p11), [#allocation5], 4294967168 }
 0x49b PF: > { %s22_s10 = sadd.s32 1, %s1014_s10   ;;  %s1273_s27 = smov %s998_s28 }
 0x49c   : > { %p19_p9 = scmp.ge.s32.totalorder %s22_s10, 4   ;;  %s1274_s28 = smov %s1002_s29 }
 0x49d   : > { %s1275_s29 = smov %s1120_s17  ;;  %s1276_s30 = smov %s1010_s9 }
 0x49e   : > { %s1277_s9 = smov %s1279_s12  ;;  %21 = sbr.rel (!%p19_p9) target bundleno = 5 (0x5), region = 113 }
 0x4a5   :  { %659 = vsyncpa [#allocation4], 1 }
 0x4a6   :  { %661 = vsyncpa [#allocation4 + $0x1], 1 }
 0x4a7   :  { %662 = vsyncpa [#allocation5], 1 }
 0x4a8   :  { %664 = vsyncpa [#allocation5 + $0x1], 1 }

</bundles_post_ra>
